<compile_context>
chip_gen: v6e
topology: v6e:2x2x1
jax: 0.10.0
libtpu: 0.0.40
codegen_flags: <defaults>
</compile_context>

<pallas_src>
import functools
import math

import jax
import jax.numpy as jnp
from jax.experimental import pallas as pl
from jax.experimental.pallas import tpu as pltpu

_MIB = 1024 * 1024
# Safe on v7x (64 MiB/TC) regardless of whether get_tpu_info() reports per-chip
# or per-TensorCore capacity; well above the v5e (16 MiB) / v6e (32 MiB)
# scoped-VMEM defaults.
_VMEM_LIMIT_BYTES = 48 * _MIB
_VMEM_BUDGET_FACTOR = 0.85
_TARGET_BLOCK_BYTES = 8 * _MIB   # bytes-based input-block cap (no fixed row cap)
_MIN_BLOCK_BYTES = 1 * _MIB      # floor when forcing extra grid steps on v7x


def _layernorm_kernel(x_ref, w_ref, b_ref, o_ref, *, eps, inv_d):
    """Standard path: one logical row per sublane row, full last dim per block."""
    x = x_ref[...].astype(jnp.float32)                        # (tm, D)
    mean = jnp.sum(x, axis=-1, keepdims=True) * inv_d          # (tm, 1)
    xc = x - mean
    var = jnp.sum(xc * xc, axis=-1, keepdims=True) * inv_d     # two-pass variance
    inv_std = jax.lax.rsqrt(var + eps)                         # EUP
    w = w_ref[...].astype(jnp.float32)                         # (1, D)
    b = b_ref[...].astype(jnp.float32)
    o_ref[...] = (xc * inv_std * w + b).astype(o_ref.dtype)


def _layernorm_folded_kernel(x_ref, w_ref, b_ref, o_ref, *, eps, d, k, inv_d):
    """Lane-dense path: k logical rows folded into one (tm, k*D) lane-dense row.

    Per-segment sums and broadcast-backs are tiny MXU matmuls against a 0/1
    segment matrix (the MXU is otherwise idle), so all elementwise work and the
    final store stay in the lane-dense (tm, k*D) layout (unmasked stores).
    """
    kd = k * d
    x = x_ref[...].astype(jnp.float32)                         # (tm, k*D)
    # Segment scatter matrix S (k*D, k): S[i, j] = 1 if row i belongs to segment j.
    # Built with iota + range compares (no integer division in the kernel).
    i_idx = jax.lax.broadcasted_iota(jnp.int32, (kd, k), 0)
    j_idx = jax.lax.broadcasted_iota(jnp.int32, (kd, k), 1)
    s_mat = ((i_idx >= j_idx * d) & (i_idx < (j_idx + 1) * d)).astype(jnp.float32)
    # Transposed gather matrix (k, k*D) for broadcasting per-segment scalars back.
    it_idx = jax.lax.broadcasted_iota(jnp.int32, (k, kd), 1)
    jt_idx = jax.lax.broadcasted_iota(jnp.int32, (k, kd), 0)
    st_mat = ((it_idx >= jt_idx * d) & (it_idx < (jt_idx + 1) * d)).astype(jnp.float32)

    mean_seg = jnp.dot(x, s_mat, preferred_element_type=jnp.float32) * inv_d   # (tm, k)
    mean = jnp.dot(mean_seg, st_mat, preferred_element_type=jnp.float32)       # (tm, k*D)
    xc = x - mean
    var_seg = jnp.dot(xc * xc, s_mat, preferred_element_type=jnp.float32) * inv_d
    inv_std_seg = jax.lax.rsqrt(var_seg + eps)                                  # (tm, k)
    inv_std = jnp.dot(inv_std_seg, st_mat, preferred_element_type=jnp.float32)  # (tm, k*D)
    w = w_ref[...].astype(jnp.float32)                                          # (1, k*D)
    b = b_ref[...].astype(jnp.float32)
    o_ref[...] = (xc * inv_std * w + b).astype(o_ref.dtype)


def _num_tensorcores():
    """Best-effort TensorCore count of the local chip (v7x: 2; v5e/v6e: 1)."""
    try:
        info = pltpu.get_tpu_info()
        for attr in ("num_cores", "core_count", "tensorcore_count", "num_tensorcores"):
            v = getattr(info, attr, None)
            if v:
                return max(1, int(v))
    except Exception:
        pass
    try:
        v = getattr(jax.devices()[0], "num_cores", None)
        if v:
            return max(1, int(v))
    except Exception:
        pass
    return 1


def _pick_block_rows(rows, width, dtype, vmem_budget_bytes, num_tc):
    """Largest sublane-aligned row tile whose pipelined footprint fits the budget."""
    dtype_bytes = jnp.dtype(dtype).itemsize
    sublane = 16 if dtype_bytes == 2 else 8
    if rows <= sublane:
        return rows  # block equals the full row extent: always legal
    row_bytes = width * dtype_bytes
    # Pipelined VMEM per row: double-buffered input + output blocks (4x dtype)
    # plus ~4 f32-wide (tm, width) temporaries live in the body
    # (f32 copy of x, x - mean, its square, pre-cast result).
    per_row = width * (4 * dtype_bytes + 4 * 4)
    tm = max(1, vmem_budget_bytes // per_row)
    # Bytes-based cap instead of a fixed row count: ~8 MiB input blocks keep the
    # ~0.35us per-step overhead negligible even at v7x's 3.2 TB/s HBM.
    tm = min(tm, max(sublane, _TARGET_BLOCK_BYTES // row_bytes))
    if tm >= rows:
        tm = rows
    else:
        tm = max(sublane, (tm // sublane) * sublane)
    # Megacore: only a multi-TC chip (v7x) benefits from forcing extra grid
    # steps. Target >= 4 steps per TensorCore so each core gets DMA/compute
    # overlap, but never shrink the input block below ~1 MiB.
    if num_tc >= 2:
        min_steps = 4 * num_tc
        floor_rows = max(sublane, _MIN_BLOCK_BYTES // row_bytes)
        while (pl.cdiv(rows, tm) < min_steps and tm > sublane
               and (tm // 2) >= floor_rows):
            tm = max(sublane, ((tm // 2) // sublane) * sublane)
    return tm


def layer_norm(x, weight, bias, eps=1e-5, block_rows=None):
    """x: (..., emb_dim); weight, bias: (emb_dim,). Returns same shape/dtype as x."""
    orig_shape = x.shape
    d = orig_shape[-1]
    x2d = x.reshape(-1, d)
    rows = x2d.shape[0]
    dtype_bytes = jnp.dtype(x.dtype).itemsize
    sublane = 16 if dtype_bytes == 2 else 8

    # Lane-density folding: if D is not a multiple of the 128-lane vreg width,
    # fold k rows into the lane axis (a free row-major reshape on the host side)
    # so loads/stores are full-lane instead of masked partial stores.
    fold = 1
    if d % 128 != 0:
        k_min = 128 // math.gcd(d, 128)
        if 1 < k_min <= rows and rows % k_min == 0:
            fold = k_min
        # TODO(synk): row counts not divisible by the fold factor fall back to
        # the lane-sparse path (masked stores) instead of padding the rows.
    width = fold * d
    rows_f = rows // fold

    x_in = x2d.reshape(rows_f, width)
    w_flat = jnp.tile(weight, fold) if fold > 1 else weight
    b_flat = jnp.tile(bias, fold) if fold > 1 else bias
    w_in = w_flat.reshape(1, width)
    b_in = b_flat.reshape(1, width)

    vmem_budget = int(_VMEM_LIMIT_BYTES * _VMEM_BUDGET_FACTOR)
    if block_rows is None:
        tm = _pick_block_rows(rows_f, width, x.dtype, vmem_budget, _num_tensorcores())
    else:
        tm = max(1, min(int(block_rows), rows_f))
        if tm < rows_f:
            tm = min(rows_f, max(sublane, (tm // sublane) * sublane))

    grid = pl.cdiv(rows_f, tm)  # partial tail block: OOB reads unused, writes masked

    if fold > 1:
        kernel = functools.partial(_layernorm_folded_kernel,
                                   eps=eps, d=d, k=fold, inv_d=1.0 / d)
    else:
        kernel = functools.partial(_layernorm_kernel, eps=eps, inv_d=1.0 / d)

    out = pl.pallas_call(
        kernel,
        out_shape=jax.ShapeDtypeStruct((rows_f, width), x.dtype),
        grid_spec=pltpu.PrefetchScalarGridSpec(
            num_scalar_prefetch=0,
            grid=(grid,),
            in_specs=[
                pl.BlockSpec((tm, width), lambda i: (i, 0)),
                pl.BlockSpec((1, width), lambda i: (0, 0)),
                pl.BlockSpec((1, width), lambda i: (0, 0)),
            ],
            out_specs=pl.BlockSpec((tm, width), lambda i: (i, 0)),
        ),
        compiler_params=pltpu.CompilerParams(
            dimension_semantics=("parallel",),
            vmem_limit_bytes=_VMEM_LIMIT_BYTES,
        ),
        cost_estimate=pl.CostEstimate(
            flops=int(7 * rows * d),
            transcendentals=int(rows),
            bytes_accessed=int(2 * rows * d * dtype_bytes),
        ),
    )(x_in, w_in, b_in)

    return out.reshape(orig_shape)


def _reference(x, weight, bias, eps=1e-5):
    mean = x.mean(-1, keepdims=True)
    var = ((x - mean) ** 2).mean(-1, keepdims=True)   # unbiased=False
    return weight * (x - mean) / jnp.sqrt(var + eps) + bias


if __name__ == "__main__":
    key = jax.random.PRNGKey(0)

    # Primary case (matches the module's intended use): small emb_dim -> folded,
    # lane-dense path.
    batch, seq, emb_dim = 2, 8, 32
    x = jax.random.normal(key, (batch, seq, emb_dim), dtype=jnp.float32)
    weight = jnp.ones((emb_dim,), dtype=jnp.float32)   # nn.Parameter(torch.ones)
    bias = jnp.zeros((emb_dim,), dtype=jnp.float32)    # nn.Parameter(torch.zeros)

    y = layer_norm(x, weight, bias)
    jax.block_until_ready(y)
    assert y.shape == x.shape and y.dtype == x.dtype
    assert jnp.allclose(y, _reference(x, weight, bias), atol=1e-5, rtol=1e-5), \
        "folded-path mismatch vs reference"

    # Secondary case: emb_dim multiple of 128 -> standard path, with a forced
    # small block so the partial tail block (masked writes) is exercised too.
    k2 = jax.random.PRNGKey(1)
    x2 = jax.random.normal(k2, (3, 5, 256), dtype=jnp.float32)
    w2 = jax.random.normal(jax.random.PRNGKey(2), (256,), dtype=jnp.float32)
    b2 = jax.random.normal(jax.random.PRNGKey(3), (256,), dtype=jnp.float32)
    y2 = layer_norm(x2, w2, b2, block_rows=8)
    jax.block_until_ready(y2)
    assert jnp.allclose(y2, _reference(x2, w2, b2), atol=1e-5, rtol=1e-5), \
        "standard-path mismatch vs reference"

    print("KERNEL_OK")
</pallas_src>

<mosaic_0001>
module attributes {stable_mosaic.version = 11 : i64} {
  func.func @_layernorm_folded_kernel(%arg0: i32, %arg1: memref<4x128xf32, #tpu.memory_space<vmem>>, %arg2: memref<1x128xf32, #tpu.memory_space<vmem>>, %arg3: memref<1x128xf32, #tpu.memory_space<vmem>>, %arg4: memref<4x128xf32, #tpu.memory_space<vmem>>) attributes {dimension_semantics = [#tpu.dimension_semantics<parallel>], iteration_bounds = array<i64: 1>, scalar_prefetch = 0 : i64, scratch_operands = 0 : i64, tpu.core_type = #tpu.core_type<tc>, window_params = [{transform_indices = @transform_0, window_bounds = array<i64: 4, 128>}, {pipeline_mode = #tpu.pipeline_mode<synchronous>, transform_indices = @transform_1, window_bounds = array<i64: 1, 128>}, {pipeline_mode = #tpu.pipeline_mode<synchronous>, transform_indices = @transform_2, window_bounds = array<i64: 1, 128>}, {transform_indices = @transform_3, window_bounds = array<i64: 4, 128>}]} {
    %c0 = arith.constant 0 : index
    %c0_0 = arith.constant 0 : index
    %0 = vector.load %arg1[%c0, %c0_0] : memref<4x128xf32, #tpu.memory_space<vmem>>, vector<4x128xf32>
    %1 = tpu.iota {dimensions = array<i32: 0>} : vector<128x4xi32>
    %2 = tpu.iota {dimensions = array<i32: 1>} : vector<128x4xi32>
    %c32_i32 = arith.constant 32 : i32
    %3 = vector.broadcast %c32_i32 : i32 to vector<128x4xi32>
    %4 = arith.muli %2, %3 : vector<128x4xi32>
    %5 = arith.cmpi sge, %1, %4 : vector<128x4xi32>
    %c1_i32 = arith.constant 1 : i32
    %6 = vector.broadcast %c1_i32 : i32 to vector<128x4xi32>
    %7 = arith.addi %2, %6 : vector<128x4xi32>
    %c32_i32_1 = arith.constant 32 : i32
    %8 = vector.broadcast %c32_i32_1 : i32 to vector<128x4xi32>
    %9 = arith.muli %7, %8 : vector<128x4xi32>
    %10 = arith.cmpi slt, %1, %9 : vector<128x4xi32>
    %11 = arith.andi %5, %10 : vector<128x4xi1>
    %12 = arith.extui %11 : vector<128x4xi1> to vector<128x4xi32>
    %13 = arith.sitofp %12 : vector<128x4xi32> to vector<128x4xf32>
    %14 = tpu.iota {dimensions = array<i32: 1>} : vector<4x128xi32>
    %15 = tpu.iota {dimensions = array<i32: 0>} : vector<4x128xi32>
    %c32_i32_2 = arith.constant 32 : i32
    %16 = vector.broadcast %c32_i32_2 : i32 to vector<4x128xi32>
    %17 = arith.muli %15, %16 : vector<4x128xi32>
    %18 = arith.cmpi sge, %14, %17 : vector<4x128xi32>
    %c1_i32_3 = arith.constant 1 : i32
    %19 = vector.broadcast %c1_i32_3 : i32 to vector<4x128xi32>
    %20 = arith.addi %15, %19 : vector<4x128xi32>
    %c32_i32_4 = arith.constant 32 : i32
    %21 = vector.broadcast %c32_i32_4 : i32 to vector<4x128xi32>
    %22 = arith.muli %20, %21 : vector<4x128xi32>
    %23 = arith.cmpi slt, %14, %22 : vector<4x128xi32>
    %24 = arith.andi %18, %23 : vector<4x128xi1>
    %25 = arith.extui %24 : vector<4x128xi1> to vector<4x128xi32>
    %26 = arith.sitofp %25 : vector<4x128xi32> to vector<4x128xf32>
    %cst = arith.constant dense<0.000000e+00> : vector<4x4xf32>
    %27 = tpu.matmul %0, %13, %cst {dimension_numbers = #tpu.dot_dimension_numbers<[1], [0], [0], [1], [0, 0, 1, 1], [], []>} : vector<4x128xf32>, vector<128x4xf32>, vector<4x4xf32> -> vector<4x4xf32>
    %cst_5 = arith.constant 3.125000e-02 : f32
    %28 = vector.broadcast %cst_5 : f32 to vector<4x4xf32>
    %29 = arith.mulf %27, %28 : vector<4x4xf32>
    %cst_6 = arith.constant dense<0.000000e+00> : vector<4x128xf32>
    %30 = tpu.matmul %29, %26, %cst_6 {dimension_numbers = #tpu.dot_dimension_numbers<[1], [0], [0], [1], [0, 0, 1, 1], [], []>} : vector<4x4xf32>, vector<4x128xf32>, vector<4x128xf32> -> vector<4x128xf32>
    %31 = arith.subf %0, %30 : vector<4x128xf32>
    %32 = arith.mulf %31, %31 : vector<4x128xf32>
    %cst_7 = arith.constant dense<0.000000e+00> : vector<4x4xf32>
    %33 = tpu.matmul %32, %13, %cst_7 {dimension_numbers = #tpu.dot_dimension_numbers<[1], [0], [0], [1], [0, 0, 1, 1], [], []>} : vector<4x128xf32>, vector<128x4xf32>, vector<4x4xf32> -> vector<4x4xf32>
    %cst_8 = arith.constant 3.125000e-02 : f32
    %34 = vector.broadcast %cst_8 : f32 to vector<4x4xf32>
    %35 = arith.mulf %33, %34 : vector<4x4xf32>
    %cst_9 = arith.constant 9.99999974E-6 : f32
    %36 = vector.broadcast %cst_9 : f32 to vector<4x4xf32>
    %37 = arith.addf %35, %36 : vector<4x4xf32>
    %38 = math.rsqrt %37 : vector<4x4xf32>
    %cst_10 = arith.constant dense<0.000000e+00> : vector<4x128xf32>
    %39 = tpu.matmul %38, %26, %cst_10 {dimension_numbers = #tpu.dot_dimension_numbers<[1], [0], [0], [1], [0, 0, 1, 1], [], []>} : vector<4x4xf32>, vector<4x128xf32>, vector<4x128xf32> -> vector<4x128xf32>
    %c0_11 = arith.constant 0 : index
    %c0_12 = arith.constant 0 : index
    %40 = vector.load %arg2[%c0_11, %c0_12] : memref<1x128xf32, #tpu.memory_space<vmem>>, vector<1x128xf32>
    %c0_13 = arith.constant 0 : index
    %c0_14 = arith.constant 0 : index
    %41 = vector.load %arg3[%c0_13, %c0_14] : memref<1x128xf32, #tpu.memory_space<vmem>>, vector<1x128xf32>
    %42 = arith.mulf %31, %39 : vector<4x128xf32>
    %43 = vector.broadcast %40 : vector<1x128xf32> to vector<4x128xf32>
    %44 = arith.mulf %42, %43 : vector<4x128xf32>
    %45 = vector.broadcast %41 : vector<1x128xf32> to vector<4x128xf32>
    %46 = arith.addf %44, %45 : vector<4x128xf32>
    %c0_15 = arith.constant 0 : index
    %c0_16 = arith.constant 0 : index
    %47 = vector.load %arg4[%c0_15, %c0_16] : memref<4x128xf32, #tpu.memory_space<vmem>>, vector<4x128xf32>
    tpu.vector_store %arg4[%c0_15, %c0_16], %46 {strides = array<i32>} : memref<4x128xf32, #tpu.memory_space<vmem>>, vector<4x128xf32>,
    return
  }
  func.func @transform_0(%arg0: i32) -> (i32, i32) {
    %c0_i32 = arith.constant 0 : i32
    %c0_i32_0 = arith.constant 0 : i32
    return %arg0, %c0_i32 : i32, i32
  }
  func.func @transform_1(%arg0: i32) -> (i32, i32) {
    %c0_i32 = arith.constant 0 : i32
    %c0_i32_0 = arith.constant 0 : i32
    %c0_i32_1 = arith.constant 0 : i32
    return %c0_i32, %c0_i32_0 : i32, i32
  }
  func.func @transform_2(%arg0: i32) -> (i32, i32) {
    %c0_i32 = arith.constant 0 : i32
    %c0_i32_0 = arith.constant 0 : i32
    %c0_i32_1 = arith.constant 0 : i32
    return %c0_i32, %c0_i32_0 : i32, i32
  }
  func.func @transform_3(%arg0: i32) -> (i32, i32) {
    %c0_i32 = arith.constant 0 : i32
    %c0_i32_0 = arith.constant 0 : i32
    return %arg0, %c0_i32 : i32, i32
  }
}

</mosaic_0001>

<bundles_post_ra>
// kernel: tpu_custom_call.1
= control target key start
LH: loop header
LB: loop body
LE: loop exit
PB: predicated region body
PF: predicated region fallthrough
CT: control target
= control target key end

     0   :  { %8 = vsyncpa [#allocation3], 0  ;;  %s997_s0 = inlined_call_operand.hbm [shape: f32[4,128], index: 0, kind: input, shape index: {}]   ;;  %s998_s1 = inlined_call_operand.vmem [shape: f32[1,128], index: 1, kind: input, shape index: {}]   ;;  %s999_s2 = inlined_call_operand.vmem [shape: f32[1,128], index: 2, kind: input, shape index: {}]   ;;  %s1000_s3 = inlined_call_operand.hbm [shape: f32[4,128], index: 3, kind: output, shape index: {}]  }
   0x1   :  { %9 = vsyncpa [#allocation4], 0  ;;  %s692_s12 = smov [#allocation2]  }
   0x2   :  { %s16_s13 = sshll.u32 %s692_s12, 4  ;;  %s17_s13 = int_to_ptr.vmem [resolvable:$true] %s16_s13 }
   0x3   :  { %s656_s14 = scalar_lea.vmem %s17_s13, 64  ;;  %p661_p1 = scmp.lt.s32.totalorder %s17_s13, %s17_s13 }
   0x4   :  { %p657_p0 = scmp.ne.s32.totalorder %s17_s13, %s656_s14  ;;  %p662_p2 = scmp.lt.s32.totalorder %s656_s14, %s656_s14 }
   0x6   :  { %p663_p3 = por %p662_p2, %p661_p1 }
   0x8   :  { %p664_p4 = pnand %p663_p3, %p657_p0 }
   0xa   :  { %667 = shalt.err (!%p664_p4)
}
   0xb   :  { %19 = dma.hbm_to_vmem [thread:$0]  %s997_s0, 64, %s17_s13, [#allocation3]   ;;  %v28_v0 = vlaneseq }
   0xc   :  { %688 = dma.done.wait [#allocation3], 64  }
   0xd   :  { %689 = vsyncadd [#allocation3], 4294967232  ;;  %v693_v1 = vmov 0.0   ;;  %vm1001_vm0 = vmmov 0   ;;  %v723_v2 = vshrl.u32 %v28_v0, 7  ;;  %v725_v3 = vand.u32 127, %v28_v0 }
   0xe   :  { %561 = vmatprep.subr.mxu0 %v693_v1  ;;  %593 = vmatprep.mubr.msk.f32.mxu0 %vm1001_vm0, %v693_v1  ;;  %v695_v13 = vmov 1.0   ;;  %v1023_v26 = vmov 0  ;;  %v1025_v28 = vmov 0  ;;  %v1027_v30 = vmov 0  ;;  %v27_v39 = vld [vmem:[#allocation2] sm:$0xf] }
   0xf   :  { %596 = vmatprep.subr.mxu1 %v693_v1  ;;  %598 = vmatprep.mubr.msk.f32.mxu1 %vm1001_vm0, %v693_v1  ;;  %v44_v4 = vadd.s32 120, %v723_v2  ;;  %v732_v5 = vmul.u32 32, %v725_v3  ;;  %v64_v6 = vadd.s32 1, %v725_v3  ;;  %v43_v7 = vadd.s32 112, %v723_v2  ;;  %v521_v57 = vld [vmem:[%s998_s1] ss:$0 sm:$0xff] }
  0x10   :  { %v42_v8 = vadd.s32 104, %v723_v2  ;;  %v41_v10 = vadd.s32 96, %v723_v2  ;;  %v40_v11 = vadd.s32 88, %v723_v2  ;;  %v39_v15 = vadd.s32 80, %v723_v2  ;;  %v522_v60 = vld [vmem:[%s999_s2] ss:$0 sm:$0xff] }
  0x11   :  { %vm63_vm1 = vcmp.ge.s32.totalorder %v44_v4, %v732_v5  ;;  %v738_v9 = vmul.u32 32, %v64_v6  ;;  %vm62_vm2 = vcmp.ge.s32.totalorder %v43_v7, %v732_v5  ;;  %v38_v17 = vadd.s32 72, %v723_v2  ;;  %s696_s20 = smov [#allocation5]  }
  0x12   :  { %vm61_vm5 = vcmp.ge.s32.totalorder %v42_v8, %v732_v5  ;;  %vm60_vm9 = vcmp.ge.s32.totalorder %v41_v10, %v732_v5  ;;  %vm59_vm12 = vcmp.ge.s32.totalorder %v40_v11, %v732_v5  ;;  %vm58_vm15 = vcmp.ge.s32.totalorder %v39_v15, %v732_v5  ;;  %s459_s21 = sshll.u32 %s696_s20, 4  ;;  %s460_s21 = int_to_ptr.vmem [resolvable:$true] %s459_s21 }
  0x13   :  { %vm81_vm3 = vcmp.lt.s32.totalorder %v44_v4, %v738_v9  ;;  %vm80_vm4 = vcmp.lt.s32.totalorder %v43_v7, %v738_v9  ;;  %vm79_vm6 = vcmp.lt.s32.totalorder %v42_v8, %v738_v9  ;;  %vm78_vm10 = vcmp.lt.s32.totalorder %v41_v10, %v738_v9  ;;  %s668_s22 = scalar_lea.vmem %s460_s21, 64  ;;  %p673_p6 = scmp.lt.s32.totalorder %s460_s21, %s460_s21 }
  0x14   :  { %vm747_vm7 = vmand %vm63_vm1, %vm81_vm3  ;;  %vm77_vm13 = vcmp.lt.s32.totalorder %v40_v11, %v738_v9  ;;  %vm76_vm1 = vcmp.lt.s32.totalorder %v39_v15, %v738_v9  ;;  %v37_v19 = vadd.s32 64, %v723_v2  ;;  %vm57_vm3 = vcmp.ge.s32.totalorder %v38_v17, %v732_v5  ;;  %p669_p5 = scmp.ne.s32.totalorder %s460_s21, %s668_s22  ;;  %p674_p7 = scmp.lt.s32.totalorder %s668_s22, %s668_s22 }
  0x15   :  { %562 = vmatpush3.msk.msra.mxu0 %vm747_vm7, %v695_v13  ;;  %vm754_vm8 = vmand %vm62_vm2, %vm80_vm4  ;;  %vm75_vm4 = vcmp.lt.s32.totalorder %v38_v17, %v738_v9  ;;  %v36_v21 = vadd.s32 56, %v723_v2  ;;  %v35_v23 = vadd.s32 48, %v723_v2  ;;  %v34_v25 = vadd.s32 40, %v723_v2 }
  0x16   :  { %563 = vmatprep.subr.mxu0 %v693_v1  ;;  %vm762_vm11 = vmand %vm61_vm5, %vm79_vm6  ;;  %vm56_vm6 = vcmp.ge.s32.totalorder %v37_v19, %v732_v5  ;;  %v33_v27 = vadd.s32 32, %v723_v2  ;;  %v32_v29 = vadd.s32 24, %v723_v2  ;;  %v31_v31 = vadd.s32 16, %v723_v2  ;;  %p675_p8 = por %p674_p7, %p673_p6 }
  0x17   :  { %564 = vmatpush3.msk.msra.mxu0 %vm754_vm8, %v695_v13  ;;  %vm773_vm14 = vmand %vm60_vm9, %vm78_vm10  ;;  %vm74_vm9 = vcmp.lt.s32.totalorder %v37_v19, %v738_v9  ;;  %v1029_v32 = vmov 0  ;;  %v30_v33 = vadd.s32 8, %v723_v2  ;;  %v1031_v34 = vmov 0 }
  0x18   :  { %565 = vmatprep.subr.mxu0 %v693_v1  ;;  %vm784_vm2 = vmand %vm59_vm12, %vm77_vm13  ;;  %vm55_vm12 = vcmp.ge.s32.totalorder %v36_v21, %v732_v5  ;;  %vm73_vm13 = vcmp.lt.s32.totalorder %v36_v21, %v738_v9  ;;  %v1039_v38 = vmov 0  ;;  %v132_v40 = vadd.s32 1, %v723_v2  ;;  %p676_p9 = pnand %p675_p8, %p669_p5 }
  0x19   :  { %566 = vmatpush3.msk.msra.mxu0 %vm762_vm11, %v695_v13  ;;  %vm795_vm5 = vmand %vm58_vm15, %vm76_vm1  ;;  %vm54_vm1 = vcmp.ge.s32.totalorder %v35_v23, %v732_v5  ;;  %v130_v41 = vmul.u32 32, %v723_v2 }
  0x1a   :  { %567 = vmatprep.subr.mxu0 %v693_v1  ;;  %vm806_vm10 = vmand %vm57_vm3, %vm75_vm4  ;;  %vm72_vm3 = vcmp.lt.s32.totalorder %v35_v23, %v738_v9  ;;  %v133_v42 = vmul.u32 32, %v132_v40 }
  0x1b   :  { %568 = vmatpush3.msk.msra.mxu0 %vm773_vm14, %v695_v13  ;;  %vm817_vm15 = vmand %vm56_vm6, %vm74_vm9  ;;  %vm53_vm6 = vcmp.ge.s32.totalorder %v34_v25, %v732_v5  ;;  %vm71_vm9 = vcmp.lt.s32.totalorder %v34_v25, %v738_v9 }
  0x1c   :  { %569 = vmatprep.subr.mxu0 %v693_v1  ;;  %v1024_v26 = vsel %vm817_vm15, 4294967295, %v1023_v26  ;;  %vm828_vm4 = vmand %vm55_vm12, %vm73_vm13  ;;  %vm52_vm12 = vcmp.ge.s32.totalorder %v33_v27, %v732_v5  ;;  %vm70_vm13 = vcmp.lt.s32.totalorder %v33_v27, %v738_v9 }
  0x1d   :  { %570 = vmatpush3.msk.msra.mxu0 %vm784_vm2, %v695_v13  ;;  %v1026_v28 = vsel %vm828_vm4, 4294967295, %v1025_v28  ;;  %vm839_vm0 = vmand %vm54_vm1, %vm72_vm3  ;;  %vm51_vm1 = vcmp.ge.s32.totalorder %v32_v29, %v732_v5  ;;  %vm69_vm3 = vcmp.lt.s32.totalorder %v32_v29, %v738_v9 }
  0x1e   :  { %571 = vmatprep.subr.mxu0 %v693_v1  ;;  %v1028_v30 = vsel %vm839_vm0, 4294967295, %v1027_v30 }
  0x1f   :  { %572 = vmatpush3.msk.msra.mxu0 %vm795_vm5, %v695_v13 }
  0x20   :  { %573 = vmatprep.subr.mxu0 %v693_v1 }
  0x21   :  { %574 = vmatpush3.msk.msra.mxu0 %vm806_vm10, %v695_v13 }
  0x22   :  { %575 = vmatprep.subr.mxu0 %v693_v1 }
  0x23   :  { %576 = vmatpush3.msk.msra.mxu0 %vm817_vm15, %v695_v13  ;;  %vm850_vm15 = vmand %vm53_vm6, %vm71_vm9  ;;  %vm50_vm6 = vcmp.ge.s32.totalorder %v31_v31, %v732_v5  ;;  %vm68_vm9 = vcmp.lt.s32.totalorder %v31_v31, %v738_v9 }
  0x24   :  { %577 = vmatprep.subr.mxu0 %v693_v1  ;;  %v1030_v32 = vsel %vm850_vm15, 4294967295, %v1029_v32 }
  0x25   :  { %578 = vmatpush3.msk.msra.mxu0 %vm828_vm4, %v695_v13  ;;  %vm861_vm4 = vmand %vm52_vm12, %vm70_vm13  ;;  %vm49_vm12 = vcmp.ge.s32.totalorder %v30_v33, %v732_v5  ;;  %vm67_vm13 = vcmp.lt.s32.totalorder %v30_v33, %v738_v9 }
  0x26   :  { %579 = vmatprep.subr.mxu0 %v693_v1  ;;  %v1032_v34 = vsel %vm861_vm4, 4294967295, %v1031_v34 }
  0x27   :  { %580 = vmatpush3.msk.msra.mxu0 %vm839_vm0, %v695_v13  ;;  %vm871_vm0 = vmand %vm51_vm1, %vm69_vm3  ;;  %vm48_vm1 = vcmp.ge.s32.totalorder %v723_v2, %v732_v5  ;;  %vm66_vm3 = vcmp.lt.s32.totalorder %v723_v2, %v738_v9 }
  0x28   :  { %581 = vmatprep.subr.mxu0 %v693_v1 }
  0x29   :  { %582 = vmatpush3.msk.msra.mxu0 %vm850_vm15, %v695_v13  ;;  %vm881_vm15 = vmand %vm50_vm6, %vm68_vm9  ;;  %vm1041_vm9 = vmmov 0  }
  0x2a   :  { %583 = vmatprep.subr.mxu0 %v693_v1  ;;  %vm901_vm6 = vmand %vm48_vm1, %vm66_vm3  ;;  %vm213_vm3 = vcmask 1043456  }
  0x2b   :  { %584 = vmatpush3.msk.msra.mxu0 %vm861_vm4, %v695_v13  ;;  %vm893_vm4 = vmand %vm49_vm12, %vm67_vm13  ;;  %v1040_v38 = vsel %vm901_vm6, 4294967295, %v1039_v38  ;;  %vm131_vm12 = vcmp.ge.s32.totalorder %v725_v3, %v130_v41  ;;  %vm134_vm13 = vcmp.lt.s32.totalorder %v725_v3, %v133_v42 }
  0x2c   :  { %585 = vmatprep.subr.mxu0 %v693_v1  ;;  %vm135_vm1 = vmand %vm131_vm12, %vm134_vm13 }
  0x2d   :  { %586 = vmatpush3.msk.msra.mxu0 %vm871_vm0, %v695_v13  ;;  %v484_v43 = vsel %vm135_vm1, 1.0, %v693_v1 }
  0x2e   :  { %587 = vmatprep.subr.mxu0 %v693_v1  ;;  %597 = vmatpush3.msk.msra.mxu1 %vm213_vm3, %v484_v43 }
  0x2f   :  { %588 = vmatpush3.msk.msra.mxu0 %vm881_vm15, %v695_v13  ;;  %601 = vmatprep.subr.mxu1 %v693_v1 }
  0x30   :  { %589 = vmatprep.subr.mxu0 %v693_v1 }
  0x31   :  { %590 = vmatpush3.msk.msra.mxu0 %vm893_vm4, %v695_v13 }
  0x32   :  { %591 = vmatprep.subr.mxu0 %v693_v1 }
  0x33   :  { %592 = vmatpush3.msk.msra.mxu0 %vm901_vm6, %v695_v13  ;;  %vm209_vm6 = vcmask 31744  }
  0x34   :  { %594 = vmatmul.mubr.f32.vlgmr.msra.gmra.mxu0 %v27_v39  ;;  %636 = vmatprep.subr.mxu0 %v693_v1 }
  0x35   :  { %638 = vmatprep.mubr.msk.f32.mxu0 %vm1041_vm9, %v693_v1  ;;  %637 = vmatpush3.msk.msra.mxu0 %vm213_vm3, %v484_v43 }
  0xf4   :  { %v204_v44 = vpop.f32.mrf.mxu0 }
  0xf5   :  { %v208_v45 = vmul.f32 0.03125, %v204_v44 }
  0xf6   :  { %v595_v46 = vpop.f32.mrf.mxu0 }
  0xf7   :  { %599 = vmatmul.mubr.msk.f32.vlgmr.msra.gmra.mxu1 %vm209_vm6, %v208_v45 }
  0xf8   :  { %602 = vmatpush3.msk.msra.mxu1 %vm747_vm7, %v695_v13  ;;  %633 = vmatprep.mubr.msk.f32.mxu1 %vm1041_vm9, %v693_v1  ;;  %vm1042_vm7 = vnez %v1024_v26 }
  0xf9   :  { %603 = vmatprep.subr.mxu1 %v693_v1 }
  0xfa   :  { %604 = vmatpush3.msk.msra.mxu1 %vm754_vm8, %v695_v13  ;;  %vm1043_vm8 = vnez %v1026_v28 }
  0xfb   :  { %605 = vmatprep.subr.mxu1 %v693_v1 }
  0xfc   :  { %606 = vmatpush3.msk.msra.mxu1 %vm762_vm11, %v695_v13  ;;  %vm1044_vm11 = vnez %v1028_v30 }
  0xfd   :  { %607 = vmatprep.subr.mxu1 %v693_v1 }
  0xfe   :  { %608 = vmatpush3.msk.msra.mxu1 %vm773_vm14, %v695_v13  ;;  %vm1045_vm14 = vnez %v1030_v32 }
  0xff   :  { %609 = vmatprep.subr.mxu1 %v693_v1 }
 0x100   :  { %610 = vmatpush3.msk.msra.mxu1 %vm784_vm2, %v695_v13  ;;  %vm1046_vm2 = vnez %v1032_v34 }
 0x101   :  { %611 = vmatprep.subr.mxu1 %v693_v1 }
 0x102   :  { %612 = vmatpush3.msk.msra.mxu1 %vm795_vm5, %v695_v13  ;;  %vm1047_vm5 = vnez %v1040_v38 }
 0x103   :  { %613 = vmatprep.subr.mxu1 %v693_v1 }
 0x104   :  { %614 = vmatpush3.msk.msra.mxu1 %vm806_vm10, %v695_v13 }
 0x105   :  { %615 = vmatprep.subr.mxu1 %v693_v1 }
 0x106   :  { %616 = vmatpush3.msk.msra.mxu1 %vm1042_vm7, %v695_v13 }
 0x107   :  { %617 = vmatprep.subr.mxu1 %v693_v1 }
 0x108   :  { %618 = vmatpush3.msk.msra.mxu1 %vm1043_vm8, %v695_v13 }
 0x109   :  { %619 = vmatprep.subr.mxu1 %v693_v1 }
 0x10a   :  { %620 = vmatpush3.msk.msra.mxu1 %vm1044_vm11, %v695_v13 }
 0x10b   :  { %621 = vmatprep.subr.mxu1 %v693_v1 }
 0x10c   :  { %622 = vmatpush3.msk.msra.mxu1 %vm1045_vm14, %v695_v13 }
 0x10d   :  { %623 = vmatprep.subr.mxu1 %v693_v1 }
 0x10e   :  { %624 = vmatpush3.msk.msra.mxu1 %vm1046_vm2, %v695_v13 }
 0x10f   :  { %625 = vmatprep.subr.mxu1 %v693_v1 }
 0x110   :  { %626 = vmatpush3.msk.msra.mxu1 %vm871_vm0, %v695_v13 }
 0x111   :  { %627 = vmatprep.subr.mxu1 %v693_v1 }
 0x112   :  { %628 = vmatpush3.msk.msra.mxu1 %vm881_vm15, %v695_v13 }
 0x113   :  { %629 = vmatprep.subr.mxu1 %v693_v1 }
 0x114   :  { %630 = vmatpush3.msk.msra.mxu1 %vm893_vm4, %v695_v13 }
 0x115   :  { %631 = vmatprep.subr.mxu1 %v693_v1 }
 0x116   :  { %632 = vmatpush3.msk.msra.mxu1 %vm1047_vm5, %v695_v13 }
 0x1b7   :  { %v283_v47 = vpop.f32.mrf.mxu1 }
 0x1b8   :  { %v287_v48 = vsub.f32 %v27_v39, %v283_v47 }
 0x1b9   :  { %v600_v49 = vpop.f32.mrf.mxu1 }
 0x1ba   :  { %v288_v50 = vmul.f32 %v287_v48, %v287_v48 }
 0x1bc   :  { %634 = vmatmul.mubr.f32.vlgmr.msra.gmra.mxu1 %v288_v50 }
 0x27c   :  { %v355_v51 = vpop.f32.mrf.mxu1 }
 0x27d   :  { %v359_v52 = vmul.f32 0.03125, %v355_v51 }
 0x27e   :  { %v635_v53 = vpop.f32.mrf.mxu1 }
 0x27f   :  { %v360_v54 = vadd.f32 1e-05, %v359_v52 }
 0x281   :  { %646 = vrsqrt.f32 %v360_v54 }
 0x28e   :  { %v647_v55 = vpop.eup %646 }
 0x28f   :  { %639 = vmatmul.mubr.msk.f32.vlgmr.msra.gmra.mxu0 %vm209_vm6, %v647_v55 }
 0x34f   :  { %v431_v56 = vpop.f32.mrf.mxu0 }
 0x350   :  { %v437_v58 = vmul.f32 %v431_v56, %v287_v48 }
 0x351   :  { %v640_v59 = vpop.f32.mrf.mxu0 }
 0x352   :  { %v444_v61 = vmul.f32 %v521_v57, %v437_v58 }
 0x354   :  { %v451_v62 = vadd.f32 %v522_v60, %v444_v61 }
 0x356   :  { %452 = vst [vmem:[#allocation5] sm:$0xf] %v451_v62 }
 0x357   :  { %679 = shalt.err (!%p676_p9)
}
 0x358   :  { %462 = dma.vmem_to_hbm [thread:$0]  %s460_s21, 64, %s1000_s3, [#allocation4]  }
 0x359   :  { %690 = dma.done.wait [#allocation4], 64  }
 0x35a   :  { %691 = vsyncadd [#allocation4], 4294967232 }
 0x35b   :  { %466 = vsyncpa [#allocation3], 1 }
 0x35c   :  { %467 = vsyncpa [#allocation4], 1 }

</bundles_post_ra>
